<compile_context>
chip_gen: v7x
topology: tpu7x:2x2x1
jax: 0.10.0
libtpu: 0.0.40
codegen_flags: <defaults>
</compile_context>

<pallas_src>
import jax
import jax.numpy as jnp
from jax.experimental import pallas as pl
from jax.experimental.pallas import tpu as pltpu


def _dma_copy_kernel(src_hbm_ref, dst_hbm_ref, copy_sem):
    # One HBM->HBM DMA covering the whole array.  No VMEM staging, no
    # vld/vst, no grid: the DMA engine moves the bytes at HBM roofline.
    cp = pltpu.make_async_copy(src_hbm_ref, dst_hbm_ref, copy_sem)
    cp.start()
    cp.wait()


def _hbm_dma_copy(x):
    """Materialize an identity copy of `x` with a single HBM->HBM DMA."""
    return pl.pallas_call(
        _dma_copy_kernel,
        out_shape=jax.ShapeDtypeStruct(x.shape, x.dtype),
        in_specs=[pl.BlockSpec(memory_space=pl.ANY)],
        out_specs=pl.BlockSpec(memory_space=pl.ANY),
        scratch_shapes=[pltpu.SemaphoreType.DMA],
        compiler_params=pltpu.CompilerParams(has_side_effects=True),
    )(x)


def gt_segmentation_forward(left, state, outputs, *, materialize=False):
    """Pallas equivalent of GTSegmentation.forward.

    left:        (BM, C, H, W) — only used for its shape (BM, H, W).
    state:       dict with 'gt_semantic_seg' reshapeable to (BM, 2, H, W).
    outputs:     dict — gets 'pred_semantic_seg' of shape (BM, 2, H, W).
    materialize: if True, produce a distinct output buffer via a single
                 HBM->HBM DMA instead of aliasing the input.  Default False
                 (pure view — matches the torch module and costs nothing).
    """
    BM, _, H, W = left.shape
    gt = state["gt_semantic_seg"]

    # torch `.view(BM, 2, H, W)` -> metadata-only reshape under XLA.
    pred = gt.reshape(BM, 2, H, W)

    if materialize:
        # Framework requires a separate buffer: single DMA copy, no VMEM.
        pred = _hbm_dma_copy(pred)

    outputs["pred_semantic_seg"] = pred
    return outputs


if __name__ == "__main__":
    key = jax.random.PRNGKey(0)
    k_left, k_gt = jax.random.split(key)

    BM, C, H, W = 2, 4, 16, 16

    # Deterministic example inputs.
    left = jax.random.normal(k_left, (BM, C, H, W), dtype=jnp.float32)
    # gt_semantic_seg arrives in a flat-ish layout and is .view'ed to
    # (BM, 2, H, W) in the original forward; emulate with (BM*2, H, W).
    gt_semantic_seg = jax.random.randint(
        k_gt, (BM * 2, H, W), minval=0, maxval=21, dtype=jnp.int32
    )

    state = {"gt_semantic_seg": gt_semantic_seg}
    ref = gt_semantic_seg.reshape(BM, 2, H, W)

    # Default path: pure routing (view), zero HBM traffic.
    outputs_view = gt_segmentation_forward(left, state, {})
    pred_view = jax.block_until_ready(outputs_view["pred_semantic_seg"])
    assert pred_view.shape == (BM, 2, H, W)
    assert pred_view.dtype == ref.dtype
    assert bool(jnp.all(pred_view == ref))

    # Materialized path: single HBM->HBM DMA Pallas kernel.
    outputs_copy = gt_segmentation_forward(left, state, {}, materialize=True)
    pred_copy = jax.block_until_ready(outputs_copy["pred_semantic_seg"])
    assert pred_copy.shape == (BM, 2, H, W)
    assert pred_copy.dtype == ref.dtype
    assert bool(jnp.all(pred_copy == ref))

    print("KERNEL_OK")
</pallas_src>

<mosaic_0001>
module attributes {stable_mosaic.version = 11 : i64} {
  func.func @_dma_copy_kernel(%arg0: memref<2x2x16x16xi32, #tpu.memory_space<any>>, %arg1: memref<2x2x16x16xi32, #tpu.memory_space<any>>, %arg2: memref<!tpu.dma_semaphore, #tpu.memory_space<semaphore_mem>>) attributes {dimension_semantics = [], scalar_prefetch = 0 : i64, scratch_operands = 1 : i64, tpu.core_type = #tpu.core_type<tc>} {
    tpu.enqueue_dma source(%arg0 : memref<2x2x16x16xi32, #tpu.memory_space<any>>) target(%arg1 : memref<2x2x16x16xi32, #tpu.memory_space<any>>) target_semaphore(%arg2 : memref<!tpu.dma_semaphore, #tpu.memory_space<semaphore_mem>>)
    tpu.wait_dma2 semaphore(%arg2 : memref<!tpu.dma_semaphore, #tpu.memory_space<semaphore_mem>>) src(%arg0 : memref<2x2x16x16xi32, #tpu.memory_space<any>>) dst(%arg1 : memref<2x2x16x16xi32, #tpu.memory_space<any>>)
    return
  }
}

</mosaic_0001>

<bundles_post_ra>
// kernel: tpu_custom_call.1
= control target key start
LH: loop header
LB: loop body
LE: loop exit
PB: predicated region body
PF: predicated region fallthrough
CT: control target
= control target key end

     0   :  { %s36_s6 = smov [#allocation2]   ;;  %s37_s7 = smov [#allocation3]   ;;  %s55_s0 = inlined_call_operand.hbm [shape: s32[2,2,16,16], index: 0, kind: input, shape index: {}]   ;;  %s56_s1 = inlined_call_operand.hbm [shape: s32[2,2,16,16], index: 1, kind: output, shape index: {}]  }
   0x1   :  { %s38_s8 = smov 0  }
   0x2   :  { %18 = dma.general %s55_s0, 1024, %s56_s1, %s36_s6, %s37_s7, [#allocation4], %s38_s8, 0  }
   0x3   :  { %34 = dma.done.wait [#allocation2], 1024 }
   0x4   :  { %35 = vsyncadd [#allocation2], 4294966272 }
   0x5   :  { %24 = vsyncmov [#allocation2] }
   0x8   :  { %s25_s13 = vpop.sfrf %24 }
   0x9   :  { %p30_p0 = scmp.ne.s32.totalorder %s25_s13, 0 }
   0xb   :  { %29 = shalt.err (%p30_p0)  }

</bundles_post_ra>
